<compile_context>
chip_gen: v7x
topology: tpu7x:2x2x1
jax: 0.10.0
libtpu: 0.0.40
codegen_flags: <defaults>
</compile_context>

<pallas_src>
import jax
import jax.numpy as jnp
from jax.experimental import pallas as pl
from jax.experimental.pallas import tpu as pltpu

EPS = 1e-5
NEG_SLOPE = 0.2
LANES = 128        # output/lane dim of every weight block padded to one lane width
VEC_ROWS = 8       # gamma1, beta1, gamma2, beta2, gamma3, beta3, bias4, <pad>


# ---------------------------------------------------------------------------
# Kernel
# ---------------------------------------------------------------------------
def _make_kernel(layer_specs):
    """layer_specs: tuple of (row_start_in_slab, contraction_dim) for the 4 Linears."""

    def kernel(x_ref, w_ref, vec_ref, o_ref):
        vec = vec_ref[...]                       # (8, 128) f32 BN affines + final bias
        h = x_ref[...]                           # (B, din0) f32, unpadded input
        inv_b = 1.0 / h.shape[0]                 # true batch size (no batch padding)

        for i in range(3):
            r, din = layer_specs[i]
            # bf16 weight tile, upcast in-register (DMA bytes halved, math in f32).
            w = w_ref[r:r + din, :].astype(jnp.float32)            # (din, 128)
            # Linear (bias omitted -- cancelled by the batch-mean subtraction below).
            h = jnp.dot(h[:, :din], w, preferred_element_type=jnp.float32)
            # Training-mode BatchNorm1d folded to scale/shift, single pass over h.
            s1 = jnp.sum(h, axis=0, keepdims=True)
            s2 = jnp.sum(h * h, axis=0, keepdims=True)
            mean = s1 * inv_b
            var = jnp.maximum(s2 * inv_b - mean * mean, 0.0)       # biased batch var
            scale = vec[2 * i] * jax.lax.rsqrt(var + EPS)          # gamma * inv_std (EUP)
            shift = vec[2 * i + 1] - mean * scale                  # beta - mean*scale
            h = h * scale + shift
            # LeakyReLU(0.2)
            h = jnp.where(h >= 0, h, NEG_SLOPE * h)

        r, din = layer_specs[3]
        w4 = w_ref[r:r + din, :].astype(jnp.float32)
        o_ref[...] = jnp.dot(h[:, :din], w4,
                             preferred_element_type=jnp.float32) + vec[6]

    return kernel


# ---------------------------------------------------------------------------
# Wrapper
# ---------------------------------------------------------------------------
def classifier_forward(x, w_slab, vec, layer_dins, output_dim):
    """x: (B, input_dim) f32.  w_slab: (sum(dins), 128) bf16.  vec: (8, 128) f32."""
    B, din0 = x.shape
    assert din0 == layer_dins[0]
    assert all(d % 8 == 0 for d in layer_dins), "contraction dims must be sublane-aligned"
    assert output_dim <= LANES

    row_starts, r = [], 0
    for d in layer_dins:
        row_starts.append(r)
        r += d
    assert w_slab.shape == (r, LANES) and w_slab.dtype == jnp.bfloat16
    assert vec.shape == (VEC_ROWS, LANES) and vec.dtype == jnp.float32

    kernel = _make_kernel(tuple(zip(row_starts, layer_dins)))

    bytes_accessed = (x.size * 4 + w_slab.size * 2 + vec.size * 4 + B * LANES * 4)
    cost = pl.CostEstimate(flops=2 * B * LANES * sum(layer_dins),
                           transcendentals=3 * LANES,
                           bytes_accessed=bytes_accessed)

    out = pl.pallas_call(
        kernel,
        out_shape=jax.ShapeDtypeStruct((B, LANES), jnp.float32),    # lane-dense store
        in_specs=[pl.BlockSpec(memory_space=pltpu.MemorySpace.VMEM),
                  pl.BlockSpec(memory_space=pltpu.MemorySpace.VMEM),
                  pl.BlockSpec(memory_space=pltpu.MemorySpace.VMEM)],
        out_specs=pl.BlockSpec(memory_space=pltpu.MemorySpace.VMEM),
        cost_estimate=cost,
    )(x, w_slab, vec)
    return out[:, :output_dim]


# ---------------------------------------------------------------------------
# Parameter construction (PyTorch-style init) and packing
# ---------------------------------------------------------------------------
def init_params(key, input_dim, hidden_dim, output_dim):
    """Deterministic PyTorch-style init. Linear weights stored as (in, out)."""
    dims = [(input_dim, hidden_dim),
            (hidden_dim, hidden_dim * 2),
            (hidden_dim * 2, hidden_dim),
            (hidden_dim, output_dim)]
    params = []
    keys = jax.random.split(key, 2 * len(dims))
    for i, (din, dout) in enumerate(dims):
        bound = 1.0 / jnp.sqrt(jnp.float32(din))
        w = jax.random.uniform(keys[2 * i], (din, dout), jnp.float32, -bound, bound)
        b = jax.random.uniform(keys[2 * i + 1], (1, dout), jnp.float32, -bound, bound)
        params.append(w)
        params.append(b)
        if i < 3:  # feedforward blocks carry a BatchNorm affine
            params.append(jnp.ones((1, dout), jnp.float32))    # gamma
            params.append(jnp.zeros((1, dout), jnp.float32))   # beta
    return params


def pack_params(params):
    """Pack the 14 PyTorch-layout params into (w_slab bf16, vec f32, layer_dins).

    b1/b2/b3 are intentionally dropped (cancelled by training-mode BatchNorm).
    w_slab rows: W1[0:32), W2[32:64), W3[64:128), W4[128:160); only the lane
    (output) dim of each weight is padded to 128.
    vec rows: g1, be1, g2, be2, g3, be3, b4, 0.
    """
    w1, _, g1, be1, w2, _, g2, be2, w3, _, g3, be3, w4, b4 = params
    weights = [w1, w2, w3, w4]
    layer_dins = tuple(int(w.shape[0]) for w in weights)

    def pad_cols(w):
        dout = w.shape[1]
        assert dout <= LANES
        return jnp.pad(w, ((0, 0), (0, LANES - dout)))

    def pad_v(v):
        v = v.reshape(-1)
        return jnp.pad(v, (0, LANES - v.shape[0]))

    w_slab = jnp.concatenate([pad_cols(w) for w in weights],
                             axis=0).astype(jnp.bfloat16)
    vec = jnp.stack([pad_v(g1), pad_v(be1), pad_v(g2), pad_v(be2),
                     pad_v(g3), pad_v(be3), pad_v(b4),
                     jnp.zeros((LANES,), jnp.float32)])
    assert w_slab.shape == (sum(layer_dins), LANES)
    return w_slab, vec, layer_dins


def _with_bf16_weights(params):
    """Round-trip only the Linear weight matrices through bf16 (what the kernel stores)."""
    q = list(params)
    for i in (0, 4, 8, 12):
        q[i] = q[i].astype(jnp.bfloat16).astype(jnp.float32)
    return q


# ---------------------------------------------------------------------------
# Plain-JAX reference with full (un-optimized) PyTorch semantics
# ---------------------------------------------------------------------------
def _reference_forward(x, params):
    idx = 0
    h = x
    for _ in range(3):
        w, b, g, be = params[idx:idx + 4]
        idx += 4
        h = h @ w + b
        mean = jnp.mean(h, axis=0, keepdims=True)
        var = jnp.mean((h - mean) ** 2, axis=0, keepdims=True)
        h = (h - mean) / jnp.sqrt(var + EPS) * g + be
        h = jnp.where(h >= 0, h, NEG_SLOPE * h)
    w, b = params[idx:idx + 2]
    return h @ w + b


if __name__ == "__main__":
    INPUT_DIM, HIDDEN_DIM, OUTPUT_DIM = 32, 32, 6
    BATCH = 8

    key = jax.random.PRNGKey(0)
    kx, kp = jax.random.split(key)
    x = jax.random.normal(kx, (BATCH, INPUT_DIM), jnp.float32)
    params = init_params(kp, INPUT_DIM, HIDDEN_DIM, OUTPUT_DIM)
    w_slab, vec, layer_dins = pack_params(params)

    out = classifier_forward(x, w_slab, vec, layer_dins, OUTPUT_DIM)
    out = jax.block_until_ready(out)

    # Reference evaluated with the same bf16-stored weights the kernel uses
    # (BN affines / biases kept in f32), so the comparison isolates kernel
    # structure from the intentional bf16 weight-storage rounding.
    ref = _reference_forward(x, _with_bf16_weights(params))
    assert out.shape == (BATCH, OUTPUT_DIM), out.shape
    assert jnp.allclose(out, ref, atol=1e-4, rtol=1e-4), "mismatch vs reference"

    print("KERNEL_OK")
</pallas_src>

<mosaic_0001>
module attributes {stable_mosaic.version = 11 : i64} {
  func.func @kernel(%arg0: memref<8x32xf32, #tpu.memory_space<vmem>>, %arg1: memref<160x128xbf16, #tpu.memory_space<vmem>>, %arg2: memref<8x128xf32, #tpu.memory_space<vmem>>, %arg3: memref<8x128xf32, #tpu.memory_space<vmem>>) attributes {dimension_semantics = [], scalar_prefetch = 0 : i64, scratch_operands = 0 : i64, tpu.core_type = #tpu.core_type<tc>} {
    %c0 = arith.constant 0 : index
    %c0_0 = arith.constant 0 : index
    %0 = vector.load %arg2[%c0, %c0_0] : memref<8x128xf32, #tpu.memory_space<vmem>>, vector<8x128xf32>
    %c0_1 = arith.constant 0 : index
    %c0_2 = arith.constant 0 : index
    %1 = vector.load %arg0[%c0_1, %c0_2] : memref<8x32xf32, #tpu.memory_space<vmem>>, vector<8x32xf32>
    %c0_3 = arith.constant 0 : index
    %c0_4 = arith.constant 0 : index
    %2 = vector.load %arg1[%c0_3, %c0_4] : memref<160x128xbf16, #tpu.memory_space<vmem>>, vector<32x128xbf16>
    %3 = arith.extf %2 : vector<32x128xbf16> to vector<32x128xf32>
    %cst = arith.constant dense<0.000000e+00> : vector<8x128xf32>
    %4 = tpu.matmul %1, %3, %cst {dimension_numbers = #tpu.dot_dimension_numbers<[1], [0], [0], [1], [0, 0, 1, 1], [], []>} : vector<8x32xf32>, vector<32x128xf32>, vector<8x128xf32> -> vector<8x128xf32>
    %cst_5 = arith.constant dense<0.000000e+00> : vector<128xf32>
    %5 = vector.multi_reduction <add>, %4, %cst_5 [0] : vector<8x128xf32> to vector<128xf32>
    %6 = vector.shape_cast %5 : vector<128xf32> to vector<1x128xf32>
    %7 = arith.mulf %4, %4 : vector<8x128xf32>
    %cst_6 = arith.constant dense<0.000000e+00> : vector<128xf32>
    %8 = vector.multi_reduction <add>, %7, %cst_6 [0] : vector<8x128xf32> to vector<128xf32>
    %9 = vector.shape_cast %8 : vector<128xf32> to vector<1x128xf32>
    %cst_7 = arith.constant 1.250000e-01 : f32
    %10 = vector.broadcast %cst_7 : f32 to vector<1x128xf32>
    %11 = arith.mulf %6, %10 : vector<1x128xf32>
    %cst_8 = arith.constant 1.250000e-01 : f32
    %12 = vector.broadcast %cst_8 : f32 to vector<1x128xf32>
    %13 = arith.mulf %9, %12 : vector<1x128xf32>
    %14 = arith.mulf %11, %11 : vector<1x128xf32>
    %15 = arith.subf %13, %14 : vector<1x128xf32>
    %cst_9 = arith.constant 0.000000e+00 : f32
    %16 = vector.broadcast %cst_9 : f32 to vector<1x128xf32>
    %17 = arith.maximumf %15, %16 : vector<1x128xf32>
    %18 = vector.extract_strided_slice %0 {offsets = [0, 0], sizes = [1, 128], strides = [1, 1]} : vector<8x128xf32> to vector<1x128xf32>
    %19 = vector.shape_cast %18 : vector<1x128xf32> to vector<128xf32>
    %cst_10 = arith.constant 9.99999974E-6 : f32
    %20 = vector.broadcast %cst_10 : f32 to vector<1x128xf32>
    %21 = arith.addf %17, %20 : vector<1x128xf32>
    %22 = math.rsqrt %21 : vector<1x128xf32>
    %23 = vector.shape_cast %19 : vector<128xf32> to vector<1x128xf32>
    %24 = arith.mulf %23, %22 : vector<1x128xf32>
    %25 = vector.extract_strided_slice %0 {offsets = [1, 0], sizes = [1, 128], strides = [1, 1]} : vector<8x128xf32> to vector<1x128xf32>
    %26 = vector.shape_cast %25 : vector<1x128xf32> to vector<128xf32>
    %27 = arith.mulf %11, %24 : vector<1x128xf32>
    %28 = vector.shape_cast %26 : vector<128xf32> to vector<1x128xf32>
    %29 = arith.subf %28, %27 : vector<1x128xf32>
    %30 = vector.broadcast %24 : vector<1x128xf32> to vector<8x128xf32>
    %31 = arith.mulf %4, %30 : vector<8x128xf32>
    %32 = vector.broadcast %29 : vector<1x128xf32> to vector<8x128xf32>
    %33 = arith.addf %31, %32 : vector<8x128xf32>
    %cst_11 = arith.constant 0.000000e+00 : f32
    %34 = vector.broadcast %cst_11 : f32 to vector<8x128xf32>
    %35 = arith.cmpf oge, %33, %34 : vector<8x128xf32>
    %cst_12 = arith.constant 2.000000e-01 : f32
    %36 = vector.broadcast %cst_12 : f32 to vector<8x128xf32>
    %37 = arith.mulf %36, %33 : vector<8x128xf32>
    %38 = arith.select %35, %33, %37 : vector<8x128xi1>, vector<8x128xf32>
    %c32 = arith.constant 32 : index
    %c0_13 = arith.constant 0 : index
    %39 = vector.load %arg1[%c32, %c0_13] : memref<160x128xbf16, #tpu.memory_space<vmem>>, vector<32x128xbf16>
    %40 = arith.extf %39 : vector<32x128xbf16> to vector<32x128xf32>
    %41 = vector.extract_strided_slice %38 {offsets = [0, 0], sizes = [8, 32], strides = [1, 1]} : vector<8x128xf32> to vector<8x32xf32>
    %cst_14 = arith.constant dense<0.000000e+00> : vector<8x128xf32>
    %42 = tpu.matmul %41, %40, %cst_14 {dimension_numbers = #tpu.dot_dimension_numbers<[1], [0], [0], [1], [0, 0, 1, 1], [], []>} : vector<8x32xf32>, vector<32x128xf32>, vector<8x128xf32> -> vector<8x128xf32>
    %cst_15 = arith.constant dense<0.000000e+00> : vector<128xf32>
    %43 = vector.multi_reduction <add>, %42, %cst_15 [0] : vector<8x128xf32> to vector<128xf32>
    %44 = vector.shape_cast %43 : vector<128xf32> to vector<1x128xf32>
    %45 = arith.mulf %42, %42 : vector<8x128xf32>
    %cst_16 = arith.constant dense<0.000000e+00> : vector<128xf32>
    %46 = vector.multi_reduction <add>, %45, %cst_16 [0] : vector<8x128xf32> to vector<128xf32>
    %47 = vector.shape_cast %46 : vector<128xf32> to vector<1x128xf32>
    %cst_17 = arith.constant 1.250000e-01 : f32
    %48 = vector.broadcast %cst_17 : f32 to vector<1x128xf32>
    %49 = arith.mulf %44, %48 : vector<1x128xf32>
    %cst_18 = arith.constant 1.250000e-01 : f32
    %50 = vector.broadcast %cst_18 : f32 to vector<1x128xf32>
    %51 = arith.mulf %47, %50 : vector<1x128xf32>
    %52 = arith.mulf %49, %49 : vector<1x128xf32>
    %53 = arith.subf %51, %52 : vector<1x128xf32>
    %cst_19 = arith.constant 0.000000e+00 : f32
    %54 = vector.broadcast %cst_19 : f32 to vector<1x128xf32>
    %55 = arith.maximumf %53, %54 : vector<1x128xf32>
    %56 = vector.extract_strided_slice %0 {offsets = [2, 0], sizes = [1, 128], strides = [1, 1]} : vector<8x128xf32> to vector<1x128xf32>
    %57 = vector.shape_cast %56 : vector<1x128xf32> to vector<128xf32>
    %cst_20 = arith.constant 9.99999974E-6 : f32
    %58 = vector.broadcast %cst_20 : f32 to vector<1x128xf32>
    %59 = arith.addf %55, %58 : vector<1x128xf32>
    %60 = math.rsqrt %59 : vector<1x128xf32>
    %61 = vector.shape_cast %57 : vector<128xf32> to vector<1x128xf32>
    %62 = arith.mulf %61, %60 : vector<1x128xf32>
    %63 = vector.extract_strided_slice %0 {offsets = [3, 0], sizes = [1, 128], strides = [1, 1]} : vector<8x128xf32> to vector<1x128xf32>
    %64 = vector.shape_cast %63 : vector<1x128xf32> to vector<128xf32>
    %65 = arith.mulf %49, %62 : vector<1x128xf32>
    %66 = vector.shape_cast %64 : vector<128xf32> to vector<1x128xf32>
    %67 = arith.subf %66, %65 : vector<1x128xf32>
    %68 = vector.broadcast %62 : vector<1x128xf32> to vector<8x128xf32>
    %69 = arith.mulf %42, %68 : vector<8x128xf32>
    %70 = vector.broadcast %67 : vector<1x128xf32> to vector<8x128xf32>
    %71 = arith.addf %69, %70 : vector<8x128xf32>
    %cst_21 = arith.constant 0.000000e+00 : f32
    %72 = vector.broadcast %cst_21 : f32 to vector<8x128xf32>
    %73 = arith.cmpf oge, %71, %72 : vector<8x128xf32>
    %cst_22 = arith.constant 2.000000e-01 : f32
    %74 = vector.broadcast %cst_22 : f32 to vector<8x128xf32>
    %75 = arith.mulf %74, %71 : vector<8x128xf32>
    %76 = arith.select %73, %71, %75 : vector<8x128xi1>, vector<8x128xf32>
    %c64 = arith.constant 64 : index
    %c0_23 = arith.constant 0 : index
    %77 = vector.load %arg1[%c64, %c0_23] : memref<160x128xbf16, #tpu.memory_space<vmem>>, vector<64x128xbf16>
    %78 = arith.extf %77 : vector<64x128xbf16> to vector<64x128xf32>
    %79 = vector.extract_strided_slice %76 {offsets = [0, 0], sizes = [8, 64], strides = [1, 1]} : vector<8x128xf32> to vector<8x64xf32>
    %cst_24 = arith.constant dense<0.000000e+00> : vector<8x128xf32>
    %80 = tpu.matmul %79, %78, %cst_24 {dimension_numbers = #tpu.dot_dimension_numbers<[1], [0], [0], [1], [0, 0, 1, 1], [], []>} : vector<8x64xf32>, vector<64x128xf32>, vector<8x128xf32> -> vector<8x128xf32>
    %cst_25 = arith.constant dense<0.000000e+00> : vector<128xf32>
    %81 = vector.multi_reduction <add>, %80, %cst_25 [0] : vector<8x128xf32> to vector<128xf32>
    %82 = vector.shape_cast %81 : vector<128xf32> to vector<1x128xf32>
    %83 = arith.mulf %80, %80 : vector<8x128xf32>
    %cst_26 = arith.constant dense<0.000000e+00> : vector<128xf32>
    %84 = vector.multi_reduction <add>, %83, %cst_26 [0] : vector<8x128xf32> to vector<128xf32>
    %85 = vector.shape_cast %84 : vector<128xf32> to vector<1x128xf32>
    %cst_27 = arith.constant 1.250000e-01 : f32
    %86 = vector.broadcast %cst_27 : f32 to vector<1x128xf32>
    %87 = arith.mulf %82, %86 : vector<1x128xf32>
    %cst_28 = arith.constant 1.250000e-01 : f32
    %88 = vector.broadcast %cst_28 : f32 to vector<1x128xf32>
    %89 = arith.mulf %85, %88 : vector<1x128xf32>
    %90 = arith.mulf %87, %87 : vector<1x128xf32>
    %91 = arith.subf %89, %90 : vector<1x128xf32>
    %cst_29 = arith.constant 0.000000e+00 : f32
    %92 = vector.broadcast %cst_29 : f32 to vector<1x128xf32>
    %93 = arith.maximumf %91, %92 : vector<1x128xf32>
    %94 = vector.extract_strided_slice %0 {offsets = [4, 0], sizes = [1, 128], strides = [1, 1]} : vector<8x128xf32> to vector<1x128xf32>
    %95 = vector.shape_cast %94 : vector<1x128xf32> to vector<128xf32>
    %cst_30 = arith.constant 9.99999974E-6 : f32
    %96 = vector.broadcast %cst_30 : f32 to vector<1x128xf32>
    %97 = arith.addf %93, %96 : vector<1x128xf32>
    %98 = math.rsqrt %97 : vector<1x128xf32>
    %99 = vector.shape_cast %95 : vector<128xf32> to vector<1x128xf32>
    %100 = arith.mulf %99, %98 : vector<1x128xf32>
    %101 = vector.extract_strided_slice %0 {offsets = [5, 0], sizes = [1, 128], strides = [1, 1]} : vector<8x128xf32> to vector<1x128xf32>
    %102 = vector.shape_cast %101 : vector<1x128xf32> to vector<128xf32>
    %103 = arith.mulf %87, %100 : vector<1x128xf32>
    %104 = vector.shape_cast %102 : vector<128xf32> to vector<1x128xf32>
    %105 = arith.subf %104, %103 : vector<1x128xf32>
    %106 = vector.broadcast %100 : vector<1x128xf32> to vector<8x128xf32>
    %107 = arith.mulf %80, %106 : vector<8x128xf32>
    %108 = vector.broadcast %105 : vector<1x128xf32> to vector<8x128xf32>
    %109 = arith.addf %107, %108 : vector<8x128xf32>
    %cst_31 = arith.constant 0.000000e+00 : f32
    %110 = vector.broadcast %cst_31 : f32 to vector<8x128xf32>
    %111 = arith.cmpf oge, %109, %110 : vector<8x128xf32>
    %cst_32 = arith.constant 2.000000e-01 : f32
    %112 = vector.broadcast %cst_32 : f32 to vector<8x128xf32>
    %113 = arith.mulf %112, %109 : vector<8x128xf32>
    %114 = arith.select %111, %109, %113 : vector<8x128xi1>, vector<8x128xf32>
    %c128 = arith.constant 128 : index
    %c0_33 = arith.constant 0 : index
    %115 = vector.load %arg1[%c128, %c0_33] : memref<160x128xbf16, #tpu.memory_space<vmem>>, vector<32x128xbf16>
    %116 = arith.extf %115 : vector<32x128xbf16> to vector<32x128xf32>
    %117 = vector.extract_strided_slice %114 {offsets = [0, 0], sizes = [8, 32], strides = [1, 1]} : vector<8x128xf32> to vector<8x32xf32>
    %cst_34 = arith.constant dense<0.000000e+00> : vector<8x128xf32>
    %118 = tpu.matmul %117, %116, %cst_34 {dimension_numbers = #tpu.dot_dimension_numbers<[1], [0], [0], [1], [0, 0, 1, 1], [], []>} : vector<8x32xf32>, vector<32x128xf32>, vector<8x128xf32> -> vector<8x128xf32>
    %119 = vector.extract_strided_slice %0 {offsets = [6, 0], sizes = [1, 128], strides = [1, 1]} : vector<8x128xf32> to vector<1x128xf32>
    %120 = vector.shape_cast %119 : vector<1x128xf32> to vector<128xf32>
    %121 = vector.shape_cast %120 : vector<128xf32> to vector<1x128xf32>
    %122 = vector.broadcast %121 : vector<1x128xf32> to vector<8x128xf32>
    %123 = arith.addf %118, %122 : vector<8x128xf32>
    %c0_35 = arith.constant 0 : index
    %c0_36 = arith.constant 0 : index
    %124 = vector.load %arg3[%c0_35, %c0_36] : memref<8x128xf32, #tpu.memory_space<vmem>>, vector<8x128xf32>
    tpu.vector_store %arg3[%c0_35, %c0_36], %123 {strides = array<i32>} : memref<8x128xf32, #tpu.memory_space<vmem>>, vector<8x128xf32>,
    return
  }
}

</mosaic_0001>

<bundles_post_ra>
// kernel: tpu_custom_call.1
= control target key start
LH: loop header
LB: loop body
LE: loop exit
PB: predicated region body
PF: predicated region fallthrough
CT: control target
= control target key end

     0   :  { %8 = vsyncpa [#allocation3], 0  ;;  %s906_s0 = inlined_call_operand.hbm [shape: f32[8,32], index: 0, kind: input, shape index: {}]   ;;  %s907_s1 = inlined_call_operand.hbm [shape: bf16[160,128], index: 1, kind: input, shape index: {}]   ;;  %s908_s2 = inlined_call_operand.hbm [shape: f32[8,128], index: 2, kind: input, shape index: {}]   ;;  %s909_s3 = inlined_call_operand.hbm [shape: f32[8,128], index: 3, kind: output, shape index: {}]  }
   0x1   :  { %9 = vsyncpa [#allocation6], 0 }
   0x2   :  { %10 = vsyncpa [#allocation4], 0  ;;  %s794_s12 = smov [#allocation5]   ;;  %s700_s16 = scalar_lea.hbm %s907_s1, 1280 }
   0x3   :  { %s26_s13 = sshll.u32 %s794_s12, 4  ;;  %p701_p0 = scmp.ne.s32.totalorder %s907_s1, %s700_s16  ;;  %s27_s13 = int_to_ptr.vmem [resolvable:$true] %s26_s13 }
   0x4   :  { %p704_p1 = scmp.lt.u32.totalorder %s700_s16, %s907_s1 }
   0x6   :  { %p706_p2 = pnand %p704_p1, %p701_p0 }
   0x8   :  { %709 = shalt.err (!%p706_p2)
}
   0x9   :  { %s710_s21 = scalar_lea.vmem %s27_s13, 1280  ;;  %p715_p4 = scmp.lt.s32.totalorder %s27_s13, %s27_s13 }
   0xa   :  { %p711_p3 = scmp.ne.s32.totalorder %s27_s13, %s710_s21  ;;  %p716_p5 = scmp.lt.s32.totalorder %s710_s21, %s710_s21 }
   0xc   :  { %p717_p6 = por %p716_p5, %p715_p4 }
   0xe   :  { %p718_p7 = pnand %p717_p6, %p711_p3 }
  0x10   :  { %721 = shalt.err (!%p718_p7)
}
  0x11   :  { %s795_s22 = smov 64   ;;  %s796_s23 = smov 4  }
  0x12   :  { %32 = dma.hbm_to_vmem [thread:$0]  %s907_s1, 1280, %s27_s13, [#allocation6], %s795_s22, %s795_s22, %s796_s23  }
  0x13   :  { %s797_s26 = smov [#allocation2]   ;;  %s798_s28 = smov [#allocation7]  }
  0x14   :  { %s17_s27 = sshll.u32 %s797_s26, 4  ;;  %s39_s29 = sshll.u32 %s798_s28, 4  ;;  %s18_s27 = int_to_ptr.vmem [resolvable:$true] %s17_s27  ;;  %s40_s29 = int_to_ptr.vmem [resolvable:$true] %s39_s29 }
  0x15   :  { %s722_s5 = scalar_lea.hbm %s906_s0, 128 }
  0x16   :  { %p723_p8 = scmp.ne.s32.totalorder %s906_s0, %s722_s5  ;;  %p726_p9 = scmp.lt.u32.totalorder %s722_s5, %s906_s0 }
  0x18   :  { %p728_p10 = pnand %p726_p9, %p723_p8 }
  0x1a   :  { %731 = shalt.err (!%p728_p10)
}
  0x1b   :  { %s732_s1 = scalar_lea.vmem %s18_s27, 128  ;;  %p737_p12 = scmp.lt.s32.totalorder %s18_s27, %s18_s27 }
  0x1c   :  { %p733_p11 = scmp.ne.s32.totalorder %s18_s27, %s732_s1  ;;  %p738_p13 = scmp.lt.s32.totalorder %s732_s1, %s732_s1 }
  0x1e   :  { %p739_p0 = por %p738_p13, %p737_p12 }
  0x20   :  { %p740_p1 = pnand %p739_p0, %p733_p11 }
  0x22   :  { %743 = shalt.err (!%p740_p1)
}
  0x23   :  { %20 = dma.hbm_to_vmem [thread:$0]  %s906_s0, 128, %s18_s27, [#allocation3]  }
  0x24   :  { %s744_s14 = scalar_lea.hbm %s908_s2, 128 }
  0x25   :  { %p745_p2 = scmp.ne.s32.totalorder %s908_s2, %s744_s14  ;;  %p748_p3 = scmp.lt.u32.totalorder %s744_s14, %s908_s2 }
  0x27   :  { %p750_p4 = pnand %p748_p3, %p745_p2 }
  0x29   :  { %753 = shalt.err (!%p750_p4)
}
  0x2a   :  { %s754_s19 = scalar_lea.vmem %s40_s29, 128  ;;  %p759_p6 = scmp.lt.s32.totalorder %s40_s29, %s40_s29 }
  0x2b   :  { %p755_p5 = scmp.ne.s32.totalorder %s40_s29, %s754_s19  ;;  %p760_p7 = scmp.lt.s32.totalorder %s754_s19, %s754_s19 }
  0x2d   :  { %p761_p8 = por %p760_p7, %p759_p6 }
  0x2f   :  { %p762_p9 = pnand %p761_p8, %p755_p5 }
  0x31   :  { %765 = shalt.err (!%p762_p9)
}
  0x32   :  { %42 = dma.hbm_to_vmem [thread:$0]  %s908_s2, 128, %s40_s29, [#allocation6]  }
  0x33   :  { %788 = dma.done.wait [#allocation3], 128  }
  0x34   :  { %789 = vsyncadd [#allocation3], 4294967168 }
  0x35   :  { %790 = dma.done.wait [#allocation6], 1408  }
  0x36   :  { %791 = vsyncadd [#allocation6], 4294965888  ;;  %v799_v0 = vmov 0.0|0.0   ;;  %vm800_vm0 = vmmov 0   ;;  %v801_v1 = vmov 0.0   ;;  %v531_v2 = vld [vmem:[#allocation5] sm:$0xff]   ;;  %v162_v28 = vlaneseq }
  0x37   :  { %655 = vmatprep.subr.bf16.mxu0 %v799_v0  ;;  %611 = vmatprep.mubr.msk.f32.mxu0 %vm800_vm0, %v801_v1  ;;  %v570_v3 = vld [vmem:[#allocation5 + $0x8] sm:$0xff]   ;;  %v53_v4 = vld [vmem:[#allocation2] sm:$0xff]  ;;  %vm62_vm1 = vcmask 261120   ;;  %v571_v5 = vld [vmem:[#allocation5 + $0x10] sm:$0xff]   ;;  %vm311_vm4 = vcmask 523264   ;;  %s802_s2 = smov [#allocation8]  }
  0x38   :  { %661 = vmatprep.subr.bf16.mxu1 %v799_v0  ;;  %622 = vmatprep.mubr.msk.f32.mxu1 %vm800_vm0, %v801_v1  ;;  %v572_v6 = vld [vmem:[#allocation5 + $0x18] sm:$0xff]   ;;  %v869_v29 = vshrl.u32 %v162_v28, 7  ;;  %v871_v30 = vld [vmem:[#allocation7] sm:$0xff]  ;;  %v573_v44 = vld [vmem:[#allocation5 + $0x20] sm:$0xff]   ;;  %s516_s21 = sshll.u32 %s802_s2, 4  ;;  %s517_s21 = int_to_ptr.vmem [resolvable:$true] %s516_s21 }
  0x39   :  { %657 = vmatpush3.bf16.msra.mxu0 %v531_v2  ;;  %663 = vmatpush3.bf16.msra.mxu1 %v571_v5  ;;  %v574_v45 = vld [vmem:[#allocation5 + $0x28] sm:$0xff]   ;;  %v575_v46 = vld [vmem:[#allocation5 + $0x30] sm:$0xff]   ;;  %v576_v47 = vld [vmem:[#allocation5 + $0x38] sm:$0xff]   ;;  %s766_s22 = scalar_lea.vmem %s517_s21, 128  ;;  %p771_p11 = scmp.lt.s32.totalorder %s517_s21, %s517_s21 }
  0x3a   :  { %658 = vmatprep.subr.bf16.mxu0 %v799_v0  ;;  %664 = vmatprep.subr.bf16.mxu1 %v799_v0  ;;  %v164_v33 = vsub.s32 0, %v869_v29  ;;  %v169_v37 = vsub.s32 1, %v869_v29  ;;  %p767_p10 = scmp.ne.s32.totalorder %s517_s21, %s766_s22  ;;  %p772_p12 = scmp.lt.s32.totalorder %s766_s22, %s766_s22 }
  0x3c   :  { %p773_p13 = por %p772_p12, %p771_p11 }
  0x3d   :  { %660 = vmatpush3.bf16.msra.mxu0 %v570_v3  ;;  %666 = vmatpush3.bf16.msra.mxu1 %v572_v6 }
  0x3e   :  { %667 = vmatprep.subr.bf16.mxu0 %v799_v0  ;;  %679 = vmatprep.subr.bf16.mxu1 %v799_v0  ;;  %p774_p0 = pnand %p773_p13, %p767_p10 }
  0x40   :  { %612 = vmatmul.mubr.msk.f32.vlgmr.msra.gmra.mrb[0].mxu0 %vm62_vm1, %v53_v4 }
  0x41   :  { %641 = vmatprep.mubr.msk.f32.mxu0 %vm800_vm0, %v801_v1  ;;  %669 = vmatpush3.bf16.msra.mxu0 %v573_v44 }
  0x42   :  { %670 = vmatprep.subr.bf16.mxu0 %v799_v0 }
  0x45   :  { %672 = vmatpush3.bf16.msra.mxu0 %v574_v45  ;;  %v413_v45 = vsub.s32 4, %v869_v29 }
  0x46   :  { %673 = vmatprep.subr.bf16.mxu0 %v799_v0 }
  0x49   :  { %675 = vmatpush3.bf16.msra.mxu0 %v575_v46 }
  0x4a   :  { %676 = vmatprep.subr.bf16.mxu0 %v799_v0 }
  0x4d   :  { %678 = vmatpush3.bf16.msra.mxu0 %v576_v47 }
 0x113   :  { %v132_v7 = vpop.f32.mrb[0].mxu0 }
 0x114   :  { %v136_v8 = vrot.slane %v132_v7, 4  ;;  %v142_v9 = vmul.f32 %v132_v7, %v132_v7  ;;  %v613_v10 = vpop.f32.mrb[1].mxu0 }
 0x116   :  { %v137_v11 = vadd.f32 %v136_v8, %v132_v7  ;;  %v143_v12 = vrot.slane %v142_v9, 4  ;;  %v284_v8 = vsub.s32 2, %v869_v29 }
 0x118   :  { %v138_v13 = vrot.slane %v137_v11, 2  ;;  %v144_v14 = vadd.f32 %v143_v12, %v142_v9  ;;  %v289_v12 = vsub.s32 3, %v869_v29 }
 0x11a   :  { %v139_v15 = vadd.f32 %v138_v13, %v137_v11  ;;  %v145_v16 = vrot.slane %v144_v14, 2 }
 0x11c   :  { %v140_v17 = vrot.slane %v139_v15, 1  ;;  %v146_v18 = vadd.f32 %v145_v16, %v144_v14 }
 0x11e   :  { %v141_v19 = vadd.f32 %v140_v17, %v139_v15  ;;  %v147_v20 = vrot.slane %v146_v18, 1 }
 0x120   :  { %v148_v21 = vadd.f32 %v147_v20, %v146_v18  ;;  %v149_v22 = vmul.f32 0.125, %v141_v19  ;;  %v577_v19 = vld [vmem:[#allocation5 + $0x40] sm:$0xff]   ;;  %v578_v20 = vld [vmem:[#allocation5 + $0x48] sm:$0xff]  }
 0x122   :  { %v150_v23 = vmul.f32 0.125, %v148_v21  ;;  %v151_v24 = vmul.f32 %v149_v22, %v149_v22 }
 0x124   :  { %v152_v25 = vsub.f32 %v150_v23, %v151_v24 }
 0x126   :  { %v153_v26 = vmax.f32 %v152_v25, 0.0 }
 0x128   :  { %v154_v27 = vadd.f32 1e-05, %v153_v26 }
 0x12a   :  { %694 = vrsqrt.f32 %v154_v27 }
 0x134   :  { %v695_v31 = vpop.eup %694 }
 0x135   :  { %v156_v32 = vmul.f32 %v695_v31, %v871_v30 }
 0x137   :  { %v157_v34 = vmul.f32 %v156_v32, %v149_v22  ;;  %v165_v36 = vrot.slane %v156_v32, %v164_v33 }
 0x139   :  { %v159_v35 = vrot.slane %v157_v34, 7  ;;  %v166_v39 = vmul.f32 %v165_v36, %v132_v7 }
 0x13b   :  { %v161_v38 = vsub.f32 %v871_v30, %v159_v35 }
 0x13d   :  { %v170_v40 = vrot.slane %v161_v38, %v169_v37 }
 0x13f   :  { %v171_v41 = vadd.f32 %v170_v40, %v166_v39 }
 0x141   :  { %vm172_vm2 = vcmp.ge.f32.partialorder %v171_v41, 0.0  ;;  %v173_v42 = vmul.f32 0.2, %v171_v41 }
 0x143   :  { %v174_v43 = vsel %vm172_vm2, %v171_v41, %v173_v42 }
 0x144   :  { %623 = vmatmul.mubr.msk.f32.vlgmr.msra.gmra.mrb[0].mxu1 %vm62_vm1, %v174_v43 }
 0x145   :  { %652 = vmatprep.mubr.msk.f32.mxu1 %vm800_vm0, %v801_v1  ;;  %681 = vmatpush3.bf16.msra.mxu1 %v577_v19 }
 0x146   :  { %682 = vmatprep.subr.bf16.mxu1 %v799_v0 }
 0x149   :  { %684 = vmatpush3.bf16.msra.mxu1 %v578_v20 }
 0x217   :  { %v252_v48 = vpop.f32.mrb[0].mxu1 }
 0x218   :  { %v256_v49 = vrot.slane %v252_v48, 4  ;;  %v262_v50 = vmul.f32 %v252_v48, %v252_v48  ;;  %v624_v51 = vpop.f32.mrb[1].mxu1 }
 0x21a   :  { %v257_v52 = vadd.f32 %v256_v49, %v252_v48  ;;  %v263_v53 = vrot.slane %v262_v50, 4  ;;  %v418_v49 = vsub.s32 5, %v869_v29 }
 0x21c   :  { %v258_v54 = vrot.slane %v257_v52, 2  ;;  %v264_v55 = vadd.f32 %v263_v53, %v262_v50 }
 0x21e   :  { %v259_v56 = vadd.f32 %v258_v54, %v257_v52  ;;  %v265_v57 = vrot.slane %v264_v55, 2 }
 0x220   :  { %v260_v58 = vrot.slane %v259_v56, 1  ;;  %v266_v59 = vadd.f32 %v265_v57, %v264_v55 }
 0x222   :  { %v261_v60 = vadd.f32 %v260_v58, %v259_v56  ;;  %v267_v61 = vrot.slane %v266_v59, 1  ;;  %v434_v56 = vsub.s32 6, %v869_v29 }
 0x224   :  { %v268_v62 = vadd.f32 %v267_v61, %v266_v59  ;;  %v269_v63 = vmul.f32 0.125, %v261_v60  ;;  %v435_v57 = vrot.slane %v871_v30, %v434_v56 }
 0x226   :  { %v270_v1 = vmul.f32 0.125, %v268_v62  ;;  %v271_v2 = vmul.f32 %v269_v63, %v269_v63 }
 0x228   :  { %v272_v3 = vsub.f32 %v270_v1, %v271_v2 }
 0x22a   :  { %v273_v4 = vmax.f32 %v272_v3, 0.0 }
 0x22c   :  { %v274_v5 = vadd.f32 1e-05, %v273_v4 }
 0x22e   :  { %696 = vrsqrt.f32 %v274_v5 }
 0x238   :  { %v697_v6 = vpop.eup %696 }
 0x239   :  { %v276_v7 = vmul.f32 %v697_v6, %v871_v30 }
 0x23b   :  { %v277_v9 = vmul.f32 %v276_v7, %v269_v63  ;;  %v285_v11 = vrot.slane %v276_v7, %v284_v8 }
 0x23d   :  { %v279_v10 = vrot.slane %v277_v9, 7  ;;  %v286_v14 = vmul.f32 %v285_v11, %v252_v48 }
 0x23f   :  { %v281_v13 = vsub.f32 %v871_v30, %v279_v10 }
 0x241   :  { %v290_v15 = vrot.slane %v281_v13, %v289_v12 }
 0x243   :  { %v291_v16 = vadd.f32 %v290_v15, %v286_v14 }
 0x245   :  { %vm292_vm3 = vcmp.ge.f32.partialorder %v291_v16, 0.0  ;;  %v293_v17 = vmul.f32 0.2, %v291_v16 }
 0x247   :  { %v294_v18 = vsel %vm292_vm3, %v291_v16, %v293_v17 }
 0x248   :  { %642 = vmatmul.mubr.msk.f32.vlgmr.msra.gmra.mrb[2].mxu0 %vm311_vm4, %v294_v18 }
 0x31b   :  { %v381_v21 = vpop.f32.mrb[2].mxu0 }
 0x31c   :  { %v385_v22 = vrot.slane %v381_v21, 4  ;;  %v391_v23 = vmul.f32 %v381_v21, %v381_v21  ;;  %v643_v24 = vpop.f32.mrb[3].mxu0 }
 0x31e   :  { %v386_v25 = vadd.f32 %v385_v22, %v381_v21  ;;  %v392_v26 = vrot.slane %v391_v23, 4 }
 0x320   :  { %v387_v27 = vrot.slane %v386_v25, 2  ;;  %v393_v28 = vadd.f32 %v392_v26, %v391_v23 }
 0x322   :  { %v388_v31 = vadd.f32 %v387_v27, %v386_v25  ;;  %v394_v32 = vrot.slane %v393_v28, 2 }
 0x324   :  { %v389_v33 = vrot.slane %v388_v31, 1  ;;  %v395_v34 = vadd.f32 %v394_v32, %v393_v28 }
 0x326   :  { %v390_v35 = vadd.f32 %v389_v33, %v388_v31  ;;  %v396_v36 = vrot.slane %v395_v34, 1 }
 0x328   :  { %v397_v37 = vadd.f32 %v396_v36, %v395_v34  ;;  %v398_v38 = vmul.f32 0.125, %v390_v35 }
 0x32a   :  { %v399_v39 = vmul.f32 0.125, %v397_v37  ;;  %v400_v0 = vmul.f32 %v398_v38, %v398_v38 }
 0x32c   :  { %v401_v40 = vsub.f32 %v399_v39, %v400_v0 }
 0x32e   :  { %v402_v41 = vmax.f32 %v401_v40, 0.0 }
 0x330   :  { %v403_v42 = vadd.f32 1e-05, %v402_v41 }
 0x332   :  { %698 = vrsqrt.f32 %v403_v42 }
 0x33c   :  { %v699_v43 = vpop.eup %698 }
 0x33d   :  { %v405_v44 = vmul.f32 %v699_v43, %v871_v30 }
 0x33f   :  { %v406_v46 = vmul.f32 %v405_v44, %v398_v38  ;;  %v414_v48 = vrot.slane %v405_v44, %v413_v45 }
 0x341   :  { %v408_v47 = vrot.slane %v406_v46, 7  ;;  %v415_v51 = vmul.f32 %v414_v48, %v381_v21 }
 0x343   :  { %v410_v50 = vsub.f32 %v871_v30, %v408_v47 }
 0x345   :  { %v419_v52 = vrot.slane %v410_v50, %v418_v49 }
 0x347   :  { %v420_v53 = vadd.f32 %v419_v52, %v415_v51 }
 0x349   :  { %vm421_vm5 = vcmp.ge.f32.partialorder %v420_v53, 0.0  ;;  %v422_v54 = vmul.f32 0.2, %v420_v53 }
 0x34b   :  { %v423_v55 = vsel %vm421_vm5, %v420_v53, %v422_v54 }
 0x34c   :  { %653 = vmatmul.mubr.msk.f32.vlgmr.msra.gmra.mrb[2].mxu1 %vm62_vm1, %v423_v55 }
 0x41f   :  { %v505_v58 = vpop.f32.mrb[2].mxu1 }
 0x420   :  { %v506_v59 = vadd.f32 %v505_v58, %v435_v57  ;;  %v654_v60 = vpop.f32.mrb[3].mxu1 }
 0x422   :  { %509 = vst [vmem:[#allocation8] sm:$0xff] %v506_v59 }
 0x423   :  { %777 = shalt.err (!%p774_p0)
}
 0x424   :  { %s778_s25 = scalar_lea.hbm %s909_s3, 128 }
 0x425   :  { %p779_p1 = scmp.ne.s32.totalorder %s909_s3, %s778_s25  ;;  %p782_p2 = scmp.lt.u32.totalorder %s778_s25, %s909_s3 }
 0x427   :  { %p784_p3 = pnand %p782_p2, %p779_p1 }
 0x429   :  { %787 = shalt.err (!%p784_p3)
}
 0x42a   :  { %519 = dma.vmem_to_hbm [thread:$0]  %s517_s21, 128, %s909_s3, [#allocation4]  }
 0x42b   :  { %792 = dma.done.wait [#allocation4], 128  }
 0x42c   :  { %793 = vsyncadd [#allocation4], 4294967168 }
 0x42d   :  { %523 = vsyncpa [#allocation3], 1 }
 0x42e   :  { %524 = vsyncpa [#allocation6], 1 }
 0x42f   :  { %525 = vsyncpa [#allocation4], 1 }

</bundles_post_ra>
